<compile_context>
chip_gen: v7x
topology: tpu7x:2x2x1
jax: 0.10.0
libtpu: 0.0.40
codegen_flags: <defaults>
</compile_context>

<pallas_src>
import jax
import jax.numpy as jnp
from jax import lax
from jax.experimental import pallas as pl
from jax.experimental.pallas import tpu as pltpu


# --------------------------------------------------------------------------
# Helpers
# --------------------------------------------------------------------------
def _round_up(x, m):
    return (x + m - 1) // m * m


def _pick_tile(padded_dim, cap):
    """Largest of (512, 256, 128) that divides padded_dim and is <= cap."""
    for c in (512, 256, 128):
        if c <= cap and padded_dim % c == 0:
            return c
    return 128


def _weight_to_mat(w_oihw):
    # (Cout, Cin, kh, kw) -> (kh*kw*Cin, Cout);  row = (i*kw + j)*Cin + ci
    cout, cin, kh, kw = w_oihw.shape
    return jnp.transpose(w_oihw, (2, 3, 1, 0)).reshape(kh * kw * cin, cout)


def _fold_bn(gamma, beta, mean, var, eps=1e-5):
    scale = gamma / jnp.sqrt(var + eps)
    bias = beta - mean * scale
    return scale, bias


# --------------------------------------------------------------------------
# Kernel 1: relu(A @ B + bias)  — full-K panel, no scratch accumulator
# --------------------------------------------------------------------------
def _matmul_bias_relu_kernel(a_ref, b_ref, bias_ref, o_ref):
    acc = jnp.dot(a_ref[...], b_ref[...], preferred_element_type=jnp.float32)
    o_ref[...] = jnp.maximum(acc + bias_ref[...], 0.0).astype(o_ref.dtype)


def _matmul_bias_relu(a, b, bias, out_dtype):
    """relu(a @ b + bias).  a:(M,K) bf16, b:(K,N) bf16, bias:(1,N) f32.
    M, N are multiples of 128 and K a multiple of 128 (padded by caller)."""
    M, K = a.shape
    _, N = b.shape
    tm = _pick_tile(M, 512)
    tn = _pick_tile(N, 512)
    # v7x megacore: avoid a degenerate (1, 1) grid when rows can be split.
    if M // tm == 1 and N // tn == 1 and tm % 16 == 0:
        tm //= 2
    grid = (M // tm, N // tn)

    cost = pl.CostEstimate(
        flops=2 * M * K * N,
        transcendentals=0,
        bytes_accessed=int(M * K * 2 + K * N * 2 * (M // tm) + M * N * 2),
    )

    return pl.pallas_call(
        _matmul_bias_relu_kernel,
        out_shape=jax.ShapeDtypeStruct((M, N), out_dtype),
        grid_spec=pltpu.PrefetchScalarGridSpec(
            num_scalar_prefetch=0,
            grid=grid,
            in_specs=[
                pl.BlockSpec((tm, K), lambda i, j: (i, 0)),
                pl.BlockSpec((K, tn), lambda i, j: (0, j)),
                pl.BlockSpec((1, tn), lambda i, j: (0, j)),
            ],
            out_specs=pl.BlockSpec((tm, tn), lambda i, j: (i, j)),
        ),
        compiler_params=pltpu.CompilerParams(
            dimension_semantics=("parallel", "parallel")),
        cost_estimate=cost,
    )(a, b, bias)


# --------------------------------------------------------------------------
# Kernel 2: conv2 (3x3, s1, p1) + bn2 + residual (1x1, s2) + relu2, fused.
# Implicit im2col: the 9 taps are in-kernel window slices of the VMEM-resident
# padded y1 block; each tap is one MXU dot accumulated in f32.
# --------------------------------------------------------------------------
def _conv2_residual_kernel(y1p_ref, w2_ref, xs_ref, wp_ref, bias_ref, o_ref):
    # Block shapes:
    #   y1p_ref : (1, Hp, Wp, C1)  bf16   spatially padded conv1 output
    #   w2_ref  : (9, C1, tn)      bf16   conv2 taps, BN2 scale folded in
    #   xs_ref  : (1, Ho*Wo, Cin)  bf16   stride-2 subsampled block input
    #   wp_ref  : (Cin, tn)        bf16   1x1 "pool" conv weights
    #   bias_ref: (1, tn)          f32    folded BN2 bias
    #   o_ref   : (1, Ho*Wo, tn)   f32
    _, hp, wp_, c1 = y1p_ref.shape
    ho, wo = hp - 2, wp_ - 2
    rows = ho * wo

    # Residual path seeds the accumulator.
    xs = xs_ref[...]                                         # (1, rows, Cin)
    acc = jnp.dot(xs[0], wp_ref[...], preferred_element_type=jnp.float32)

    y1p = y1p_ref[...]                                       # (1, Hp, Wp, C1)
    w2 = w2_ref[...]                                         # (9, C1, tn)
    for t in range(9):                                       # unrolled taps
        i, j = divmod(t, 3)
        a = y1p[0, i:i + ho, j:j + wo, :].reshape(rows, c1)
        acc = acc + jnp.dot(a, w2[t], preferred_element_type=jnp.float32)

    out = jnp.maximum(acc + bias_ref[...], 0.0).astype(o_ref.dtype)
    o_ref[...] = out[None, :, :]


# --------------------------------------------------------------------------
# ResBlockDown forward (inference)
# --------------------------------------------------------------------------
def res_block_down(x_nchw, params):
    w1, w2, wp = params["w1"], params["w2"], params["wp"]
    cout = w1.shape[0]

    # TODO(synk): keep NHWC end-to-end across a stack of blocks; boundary
    # transposes kept only for drop-in parity with the NCHW PyTorch module.
    x = jnp.transpose(x_nchw, (0, 2, 3, 1))                   # NHWC f32
    n, h, w_, cin = x.shape
    ho = (h + 2 - 3) // 2 + 1
    wo = (w_ + 2 - 3) // 2 + 1
    rows = n * ho * wo

    # Padded sizes (multiples of 128 on matmul dims only).
    k1 = 9 * cin
    k1p = _round_up(k1, 128)
    c1p = _round_up(cout, 128)        # conv1 out channels (kept padded in y1)
    n2p = _round_up(cout, 128)        # block out channels
    cinp = _round_up(cin, 128)
    mp = _round_up(rows, 128)

    # ---- conv1 (3x3, stride 2, pad 1) + bn1 + relu1 -> one matmul kernel ---
    # Patch matrix built directly in bf16 (cast fused with pad / tap stack).
    xp = jnp.pad(x, ((0, 0), (1, 1), (1, 1), (0, 0))).astype(jnp.bfloat16)
    taps = [xp[:, i:i + 2 * ho:2, j:j + 2 * wo:2, :]
            for i in range(3) for j in range(3)]
    p1 = jnp.stack(taps, axis=3).reshape(rows, k1)
    p1 = jnp.pad(p1, ((0, mp - rows), (0, k1p - k1)))

    s1, b1 = _fold_bn(params["g1"], params["be1"], params["m1"], params["v1"])
    w1m = (_weight_to_mat(w1) * s1[None, :]).astype(jnp.bfloat16)
    w1m = jnp.pad(w1m, ((0, k1p - k1), (0, c1p - cout)))
    b1p = jnp.pad(b1[None, :].astype(jnp.float32), ((0, 0), (0, c1p - cout)))

    y1 = _matmul_bias_relu(p1, w1m, b1p, jnp.bfloat16)        # (mp, c1p) bf16
    # Padded rows are garbage (relu(bias)) -> dropped; padded channels are 0.
    y1 = y1[:rows].reshape(n, ho, wo, c1p)

    # ---- conv2 + bn2 + residual + relu2 -> one fused implicit-im2col kernel -
    y1p = jnp.pad(y1, ((0, 0), (1, 1), (1, 1), (0, 0)))       # (n,ho+2,wo+2,c1p)

    s2, b2 = _fold_bn(params["g2"], params["be2"], params["m2"], params["v2"])
    w2m = jnp.transpose(w2, (2, 3, 1, 0)).reshape(9, cout, cout)
    w2m = (w2m * s2[None, None, :]).astype(jnp.bfloat16)
    w2m = jnp.pad(w2m, ((0, 0), (0, c1p - cout), (0, n2p - cout)))
    b2p = jnp.pad(b2[None, :].astype(jnp.float32), ((0, 0), (0, n2p - cout)))

    xs = x[:, 0:2 * ho:2, 0:2 * wo:2, :].astype(jnp.bfloat16)  # (n,ho,wo,cin)
    xs = jnp.pad(xs.reshape(n, ho * wo, cin), ((0, 0), (0, 0), (0, cinp - cin)))
    wpm = jnp.transpose(wp, (2, 3, 1, 0)).reshape(cin, cout).astype(jnp.bfloat16)
    wpm = jnp.pad(wpm, ((0, cinp - cin), (0, n2p - cout)))

    hp2, wp2 = ho + 2, wo + 2
    tn2 = _pick_tile(n2p, 256)
    grid2 = (n, n2p // tn2)

    cost2 = pl.CostEstimate(
        flops=2 * n * ho * wo * (9 * c1p + cinp) * n2p,
        transcendentals=0,
        bytes_accessed=int(n * hp2 * wp2 * c1p * 2 * (n2p // tn2)
                           + 9 * c1p * n2p * 2 * n
                           + n * ho * wo * (cinp * 2 + n2p * 4)),
    )

    out = pl.pallas_call(
        _conv2_residual_kernel,
        out_shape=jax.ShapeDtypeStruct((n, ho * wo, n2p), jnp.float32),
        grid_spec=pltpu.PrefetchScalarGridSpec(
            num_scalar_prefetch=0,
            grid=grid2,
            in_specs=[
                pl.BlockSpec((1, hp2, wp2, c1p), lambda b, j: (b, 0, 0, 0)),
                pl.BlockSpec((9, c1p, tn2), lambda b, j: (0, 0, j)),
                pl.BlockSpec((1, ho * wo, cinp), lambda b, j: (b, 0, 0)),
                pl.BlockSpec((cinp, tn2), lambda b, j: (0, j)),
                pl.BlockSpec((1, tn2), lambda b, j: (0, j)),
            ],
            out_specs=pl.BlockSpec((1, ho * wo, tn2), lambda b, j: (b, 0, j)),
        ),
        compiler_params=pltpu.CompilerParams(
            dimension_semantics=("parallel", "parallel")),
        cost_estimate=cost2,
    )(y1p, w2m, xs, wpm, b2p)

    out = out.reshape(n, ho, wo, n2p)[..., :cout]
    return jnp.transpose(out, (0, 3, 1, 2))                   # back to NCHW


# --------------------------------------------------------------------------
# Pure-JAX reference (NCHW, same math) for a correctness sanity check
# --------------------------------------------------------------------------
def _reference(x, params, eps=1e-5):
    def bn(y, g, b, m, v):
        return (y - m[None, :, None, None]) / jnp.sqrt(v + eps)[None, :, None, None] \
               * g[None, :, None, None] + b[None, :, None, None]

    dn = ("NCHW", "OIHW", "NCHW")
    res = lax.conv_general_dilated(x, params["wp"], (2, 2), ((0, 0), (0, 0)),
                                   dimension_numbers=dn)
    y = lax.conv_general_dilated(x, params["w1"], (2, 2), ((1, 1), (1, 1)),
                                 dimension_numbers=dn)
    y = jnp.maximum(bn(y, params["g1"], params["be1"], params["m1"], params["v1"]), 0.0)
    y = lax.conv_general_dilated(y, params["w2"], (1, 1), ((1, 1), (1, 1)),
                                 dimension_numbers=dn)
    y = bn(y, params["g2"], params["be2"], params["m2"], params["v2"]) + res
    return jnp.maximum(y, 0.0)


# --------------------------------------------------------------------------
def make_params(key, cin, cout):
    ks = jax.random.split(key, 11)
    return {
        "w1": 0.1 * jax.random.normal(ks[0], (cout, cin, 3, 3), jnp.float32),
        "w2": 0.1 * jax.random.normal(ks[1], (cout, cout, 3, 3), jnp.float32),
        "wp": 0.1 * jax.random.normal(ks[2], (cout, cin, 1, 1), jnp.float32),
        "g1": 1.0 + 0.1 * jax.random.normal(ks[3], (cout,), jnp.float32),
        "be1": 0.1 * jax.random.normal(ks[4], (cout,), jnp.float32),
        "m1": 0.1 * jax.random.normal(ks[5], (cout,), jnp.float32),
        "v1": jax.random.uniform(ks[6], (cout,), jnp.float32, 0.5, 1.5),
        "g2": 1.0 + 0.1 * jax.random.normal(ks[7], (cout,), jnp.float32),
        "be2": 0.1 * jax.random.normal(ks[8], (cout,), jnp.float32),
        "m2": 0.1 * jax.random.normal(ks[9], (cout,), jnp.float32),
        "v2": jax.random.uniform(ks[10], (cout,), jnp.float32, 0.5, 1.5),
    }


if __name__ == "__main__":
    key = jax.random.PRNGKey(0)
    kx, kp = jax.random.split(key)

    N, CIN, COUT, S = 2, 4, 8, 16
    x = jax.random.normal(kx, (N, CIN, S, S), jnp.float32)
    params = make_params(kp, CIN, COUT)

    fwd = jax.jit(res_block_down)
    out = jax.block_until_ready(fwd(x, params))
    ref = jax.block_until_ready(_reference(x, params))

    assert out.shape == (N, COUT, S // 2, S // 2), out.shape
    max_err = float(jnp.max(jnp.abs(out - ref)))
    # bf16 matmul operands / bf16 y1 intermediate (f32 accumulation) ->
    # looser tolerance than pure f32.
    assert jnp.allclose(out, ref, atol=5e-2, rtol=5e-2), f"max err = {max_err}"
    print("KERNEL_OK")
</pallas_src>

<mosaic_0001>
module attributes {stable_mosaic.version = 11 : i64} {
  func.func @_matmul_bias_relu_kernel(%arg0: i32, %arg1: i32, %arg2: memref<64x128xbf16, #tpu.memory_space<vmem>>, %arg3: memref<128x128xbf16, #tpu.memory_space<vmem>>, %arg4: memref<1x128xf32, #tpu.memory_space<vmem>>, %arg5: memref<64x128xbf16, #tpu.memory_space<vmem>>) attributes {dimension_semantics = [#tpu.dimension_semantics<parallel>, #tpu.dimension_semantics<parallel>], iteration_bounds = array<i64: 2, 1>, scalar_prefetch = 0 : i64, scratch_operands = 0 : i64, tpu.core_type = #tpu.core_type<tc>, window_params = [{transform_indices = @transform_0, window_bounds = array<i64: 64, 128>}, {transform_indices = @transform_1, window_bounds = array<i64: 128, 128>}, {transform_indices = @transform_2, window_bounds = array<i64: 1, 128>}, {transform_indices = @transform_3, window_bounds = array<i64: 64, 128>}]} {
    %c0 = arith.constant 0 : index
    %c0_0 = arith.constant 0 : index
    %0 = vector.load %arg2[%c0, %c0_0] : memref<64x128xbf16, #tpu.memory_space<vmem>>, vector<64x128xbf16>
    %c0_1 = arith.constant 0 : index
    %c0_2 = arith.constant 0 : index
    %1 = vector.load %arg3[%c0_1, %c0_2] : memref<128x128xbf16, #tpu.memory_space<vmem>>, vector<128x128xbf16>
    %cst = arith.constant dense<0.000000e+00> : vector<64x128xf32>
    %2 = tpu.matmul %0, %1, %cst {dimension_numbers = #tpu.dot_dimension_numbers<[1], [0], [0], [1], [0, 0, 1, 1], [], []>} : vector<64x128xbf16>, vector<128x128xbf16>, vector<64x128xf32> -> vector<64x128xf32>
    %c0_3 = arith.constant 0 : index
    %c0_4 = arith.constant 0 : index
    %3 = vector.load %arg4[%c0_3, %c0_4] : memref<1x128xf32, #tpu.memory_space<vmem>>, vector<1x128xf32>
    %4 = vector.broadcast %3 : vector<1x128xf32> to vector<64x128xf32>
    %5 = arith.addf %2, %4 : vector<64x128xf32>
    %cst_5 = arith.constant 0.000000e+00 : f32
    %6 = vector.broadcast %cst_5 : f32 to vector<64x128xf32>
    %7 = arith.maximumf %5, %6 : vector<64x128xf32>
    %8 = arith.truncf %7 : vector<64x128xf32> to vector<64x128xbf16>
    %c0_6 = arith.constant 0 : index
    %c0_7 = arith.constant 0 : index
    %9 = vector.load %arg5[%c0_6, %c0_7] : memref<64x128xbf16, #tpu.memory_space<vmem>>, vector<64x128xbf16>
    tpu.vector_store %arg5[%c0_6, %c0_7], %8 {strides = array<i32>} : memref<64x128xbf16, #tpu.memory_space<vmem>>, vector<64x128xbf16>,
    return
  }
  func.func @transform_0(%arg0: i32, %arg1: i32) -> (i32, i32) {
    %c0_i32 = arith.constant 0 : i32
    %c0_i32_0 = arith.constant 0 : i32
    return %arg0, %c0_i32 : i32, i32
  }
  func.func @transform_1(%arg0: i32, %arg1: i32) -> (i32, i32) {
    %c0_i32 = arith.constant 0 : i32
    %c0_i32_0 = arith.constant 0 : i32
    return %c0_i32, %arg1 : i32, i32
  }
  func.func @transform_2(%arg0: i32, %arg1: i32) -> (i32, i32) {
    %c0_i32 = arith.constant 0 : i32
    %c0_i32_0 = arith.constant 0 : i32
    return %c0_i32, %arg1 : i32, i32
  }
  func.func @transform_3(%arg0: i32, %arg1: i32) -> (i32, i32) {
    %c0_i32 = arith.constant 0 : i32
    return %arg0, %arg1 : i32, i32
  }
}

module attributes {stable_mosaic.version = 11 : i64} {
  func.func @_conv2_residual_kernel(%arg0: i32, %arg1: i32, %arg2: memref<1x10x10x128xbf16, #tpu.memory_space<vmem>>, %arg3: memref<9x128x128xbf16, #tpu.memory_space<vmem>>, %arg4: memref<1x64x128xbf16, #tpu.memory_space<vmem>>, %arg5: memref<128x128xbf16, #tpu.memory_space<vmem>>, %arg6: memref<1x128xf32, #tpu.memory_space<vmem>>, %arg7: memref<1x64x128xf32, #tpu.memory_space<vmem>>) attributes {dimension_semantics = [#tpu.dimension_semantics<parallel>, #tpu.dimension_semantics<parallel>], iteration_bounds = array<i64: 2, 1>, scalar_prefetch = 0 : i64, scratch_operands = 0 : i64, tpu.core_type = #tpu.core_type<tc>, window_params = [{transform_indices = @transform_0, window_bounds = array<i64: 1, 10, 10, 128>}, {transform_indices = @transform_1, window_bounds = array<i64: 9, 128, 128>}, {transform_indices = @transform_2, window_bounds = array<i64: 1, 64, 128>}, {transform_indices = @transform_3, window_bounds = array<i64: 128, 128>}, {transform_indices = @transform_4, window_bounds = array<i64: 1, 128>}, {transform_indices = @transform_5, window_bounds = array<i64: 1, 64, 128>}]} {
    %c0 = arith.constant 0 : index
    %c0_0 = arith.constant 0 : index
    %c0_1 = arith.constant 0 : index
    %0 = vector.load %arg4[%c0, %c0_0, %c0_1] : memref<1x64x128xbf16, #tpu.memory_space<vmem>>, vector<1x64x128xbf16>
    %1 = vector.shape_cast %0 : vector<1x64x128xbf16> to vector<64x128xbf16>
    %c0_2 = arith.constant 0 : index
    %c0_3 = arith.constant 0 : index
    %2 = vector.load %arg5[%c0_2, %c0_3] : memref<128x128xbf16, #tpu.memory_space<vmem>>, vector<128x128xbf16>
    %cst = arith.constant dense<0.000000e+00> : vector<64x128xf32>
    %3 = tpu.matmul %1, %2, %cst {dimension_numbers = #tpu.dot_dimension_numbers<[1], [0], [0], [1], [0, 0, 1, 1], [], []>} : vector<64x128xbf16>, vector<128x128xbf16>, vector<64x128xf32> -> vector<64x128xf32>
    %c0_4 = arith.constant 0 : index
    %c0_5 = arith.constant 0 : index
    %c0_6 = arith.constant 0 : index
    %c0_7 = arith.constant 0 : index
    %4 = vector.load %arg2[%c0_4, %c0_5, %c0_6, %c0_7] : memref<1x10x10x128xbf16, #tpu.memory_space<vmem>>, vector<1x10x10x128xbf16>
    %c0_8 = arith.constant 0 : index
    %c0_9 = arith.constant 0 : index
    %c0_10 = arith.constant 0 : index
    %5 = vector.load %arg3[%c0_8, %c0_9, %c0_10] : memref<9x128x128xbf16, #tpu.memory_space<vmem>>, vector<9x128x128xbf16>
    %6 = vector.extract_strided_slice %4 {offsets = [0, 0, 0, 0], sizes = [1, 8, 8, 128], strides = [1, 1, 1, 1]} : vector<1x10x10x128xbf16> to vector<1x8x8x128xbf16>
    %7 = vector.shape_cast %6 : vector<1x8x8x128xbf16> to vector<8x8x128xbf16>
    %8 = vector.shape_cast %7 : vector<8x8x128xbf16> to vector<64x128xbf16>
    %9 = vector.extract_strided_slice %5 {offsets = [0, 0, 0], sizes = [1, 128, 128], strides = [1, 1, 1]} : vector<9x128x128xbf16> to vector<1x128x128xbf16>
    %10 = vector.shape_cast %9 : vector<1x128x128xbf16> to vector<128x128xbf16>
    %cst_11 = arith.constant dense<0.000000e+00> : vector<64x128xf32>
    %11 = tpu.matmul %8, %10, %cst_11 {dimension_numbers = #tpu.dot_dimension_numbers<[1], [0], [0], [1], [0, 0, 1, 1], [], []>} : vector<64x128xbf16>, vector<128x128xbf16>, vector<64x128xf32> -> vector<64x128xf32>
    %12 = arith.addf %3, %11 : vector<64x128xf32>
    %13 = vector.extract_strided_slice %4 {offsets = [0, 0, 1, 0], sizes = [1, 8, 8, 128], strides = [1, 1, 1, 1]} : vector<1x10x10x128xbf16> to vector<1x8x8x128xbf16>
    %14 = vector.shape_cast %13 : vector<1x8x8x128xbf16> to vector<8x8x128xbf16>
    %15 = vector.shape_cast %14 : vector<8x8x128xbf16> to vector<64x128xbf16>
    %16 = vector.extract_strided_slice %5 {offsets = [1, 0, 0], sizes = [1, 128, 128], strides = [1, 1, 1]} : vector<9x128x128xbf16> to vector<1x128x128xbf16>
    %17 = vector.shape_cast %16 : vector<1x128x128xbf16> to vector<128x128xbf16>
    %cst_12 = arith.constant dense<0.000000e+00> : vector<64x128xf32>
    %18 = tpu.matmul %15, %17, %cst_12 {dimension_numbers = #tpu.dot_dimension_numbers<[1], [0], [0], [1], [0, 0, 1, 1], [], []>} : vector<64x128xbf16>, vector<128x128xbf16>, vector<64x128xf32> -> vector<64x128xf32>
    %19 = arith.addf %12, %18 : vector<64x128xf32>
    %20 = vector.extract_strided_slice %4 {offsets = [0, 0, 2, 0], sizes = [1, 8, 8, 128], strides = [1, 1, 1, 1]} : vector<1x10x10x128xbf16> to vector<1x8x8x128xbf16>
    %21 = vector.shape_cast %20 : vector<1x8x8x128xbf16> to vector<8x8x128xbf16>
    %22 = vector.shape_cast %21 : vector<8x8x128xbf16> to vector<64x128xbf16>
    %23 = vector.extract_strided_slice %5 {offsets = [2, 0, 0], sizes = [1, 128, 128], strides = [1, 1, 1]} : vector<9x128x128xbf16> to vector<1x128x128xbf16>
    %24 = vector.shape_cast %23 : vector<1x128x128xbf16> to vector<128x128xbf16>
    %cst_13 = arith.constant dense<0.000000e+00> : vector<64x128xf32>
    %25 = tpu.matmul %22, %24, %cst_13 {dimension_numbers = #tpu.dot_dimension_numbers<[1], [0], [0], [1], [0, 0, 1, 1], [], []>} : vector<64x128xbf16>, vector<128x128xbf16>, vector<64x128xf32> -> vector<64x128xf32>
    %26 = arith.addf %19, %25 : vector<64x128xf32>
    %27 = vector.extract_strided_slice %4 {offsets = [0, 1, 0, 0], sizes = [1, 8, 8, 128], strides = [1, 1, 1, 1]} : vector<1x10x10x128xbf16> to vector<1x8x8x128xbf16>
    %28 = vector.shape_cast %27 : vector<1x8x8x128xbf16> to vector<8x8x128xbf16>
    %29 = vector.shape_cast %28 : vector<8x8x128xbf16> to vector<64x128xbf16>
    %30 = vector.extract_strided_slice %5 {offsets = [3, 0, 0], sizes = [1, 128, 128], strides = [1, 1, 1]} : vector<9x128x128xbf16> to vector<1x128x128xbf16>
    %31 = vector.shape_cast %30 : vector<1x128x128xbf16> to vector<128x128xbf16>
    %cst_14 = arith.constant dense<0.000000e+00> : vector<64x128xf32>
    %32 = tpu.matmul %29, %31, %cst_14 {dimension_numbers = #tpu.dot_dimension_numbers<[1], [0], [0], [1], [0, 0, 1, 1], [], []>} : vector<64x128xbf16>, vector<128x128xbf16>, vector<64x128xf32> -> vector<64x128xf32>
    %33 = arith.addf %26, %32 : vector<64x128xf32>
    %34 = vector.extract_strided_slice %4 {offsets = [0, 1, 1, 0], sizes = [1, 8, 8, 128], strides = [1, 1, 1, 1]} : vector<1x10x10x128xbf16> to vector<1x8x8x128xbf16>
    %35 = vector.shape_cast %34 : vector<1x8x8x128xbf16> to vector<8x8x128xbf16>
    %36 = vector.shape_cast %35 : vector<8x8x128xbf16> to vector<64x128xbf16>
    %37 = vector.extract_strided_slice %5 {offsets = [4, 0, 0], sizes = [1, 128, 128], strides = [1, 1, 1]} : vector<9x128x128xbf16> to vector<1x128x128xbf16>
    %38 = vector.shape_cast %37 : vector<1x128x128xbf16> to vector<128x128xbf16>
    %cst_15 = arith.constant dense<0.000000e+00> : vector<64x128xf32>
    %39 = tpu.matmul %36, %38, %cst_15 {dimension_numbers = #tpu.dot_dimension_numbers<[1], [0], [0], [1], [0, 0, 1, 1], [], []>} : vector<64x128xbf16>, vector<128x128xbf16>, vector<64x128xf32> -> vector<64x128xf32>
    %40 = arith.addf %33, %39 : vector<64x128xf32>
    %41 = vector.extract_strided_slice %4 {offsets = [0, 1, 2, 0], sizes = [1, 8, 8, 128], strides = [1, 1, 1, 1]} : vector<1x10x10x128xbf16> to vector<1x8x8x128xbf16>
    %42 = vector.shape_cast %41 : vector<1x8x8x128xbf16> to vector<8x8x128xbf16>
    %43 = vector.shape_cast %42 : vector<8x8x128xbf16> to vector<64x128xbf16>
    %44 = vector.extract_strided_slice %5 {offsets = [5, 0, 0], sizes = [1, 128, 128], strides = [1, 1, 1]} : vector<9x128x128xbf16> to vector<1x128x128xbf16>
    %45 = vector.shape_cast %44 : vector<1x128x128xbf16> to vector<128x128xbf16>
    %cst_16 = arith.constant dense<0.000000e+00> : vector<64x128xf32>
    %46 = tpu.matmul %43, %45, %cst_16 {dimension_numbers = #tpu.dot_dimension_numbers<[1], [0], [0], [1], [0, 0, 1, 1], [], []>} : vector<64x128xbf16>, vector<128x128xbf16>, vector<64x128xf32> -> vector<64x128xf32>
    %47 = arith.addf %40, %46 : vector<64x128xf32>
    %48 = vector.extract_strided_slice %4 {offsets = [0, 2, 0, 0], sizes = [1, 8, 8, 128], strides = [1, 1, 1, 1]} : vector<1x10x10x128xbf16> to vector<1x8x8x128xbf16>
    %49 = vector.shape_cast %48 : vector<1x8x8x128xbf16> to vector<8x8x128xbf16>
    %50 = vector.shape_cast %49 : vector<8x8x128xbf16> to vector<64x128xbf16>
    %51 = vector.extract_strided_slice %5 {offsets = [6, 0, 0], sizes = [1, 128, 128], strides = [1, 1, 1]} : vector<9x128x128xbf16> to vector<1x128x128xbf16>
    %52 = vector.shape_cast %51 : vector<1x128x128xbf16> to vector<128x128xbf16>
    %cst_17 = arith.constant dense<0.000000e+00> : vector<64x128xf32>
    %53 = tpu.matmul %50, %52, %cst_17 {dimension_numbers = #tpu.dot_dimension_numbers<[1], [0], [0], [1], [0, 0, 1, 1], [], []>} : vector<64x128xbf16>, vector<128x128xbf16>, vector<64x128xf32> -> vector<64x128xf32>
    %54 = arith.addf %47, %53 : vector<64x128xf32>
    %55 = vector.extract_strided_slice %4 {offsets = [0, 2, 1, 0], sizes = [1, 8, 8, 128], strides = [1, 1, 1, 1]} : vector<1x10x10x128xbf16> to vector<1x8x8x128xbf16>
    %56 = vector.shape_cast %55 : vector<1x8x8x128xbf16> to vector<8x8x128xbf16>
    %57 = vector.shape_cast %56 : vector<8x8x128xbf16> to vector<64x128xbf16>
    %58 = vector.extract_strided_slice %5 {offsets = [7, 0, 0], sizes = [1, 128, 128], strides = [1, 1, 1]} : vector<9x128x128xbf16> to vector<1x128x128xbf16>
    %59 = vector.shape_cast %58 : vector<1x128x128xbf16> to vector<128x128xbf16>
    %cst_18 = arith.constant dense<0.000000e+00> : vector<64x128xf32>
    %60 = tpu.matmul %57, %59, %cst_18 {dimension_numbers = #tpu.dot_dimension_numbers<[1], [0], [0], [1], [0, 0, 1, 1], [], []>} : vector<64x128xbf16>, vector<128x128xbf16>, vector<64x128xf32> -> vector<64x128xf32>
    %61 = arith.addf %54, %60 : vector<64x128xf32>
    %62 = vector.extract_strided_slice %4 {offsets = [0, 2, 2, 0], sizes = [1, 8, 8, 128], strides = [1, 1, 1, 1]} : vector<1x10x10x128xbf16> to vector<1x8x8x128xbf16>
    %63 = vector.shape_cast %62 : vector<1x8x8x128xbf16> to vector<8x8x128xbf16>
    %64 = vector.shape_cast %63 : vector<8x8x128xbf16> to vector<64x128xbf16>
    %65 = vector.extract_strided_slice %5 {offsets = [8, 0, 0], sizes = [1, 128, 128], strides = [1, 1, 1]} : vector<9x128x128xbf16> to vector<1x128x128xbf16>
    %66 = vector.shape_cast %65 : vector<1x128x128xbf16> to vector<128x128xbf16>
    %cst_19 = arith.constant dense<0.000000e+00> : vector<64x128xf32>
    %67 = tpu.matmul %64, %66, %cst_19 {dimension_numbers = #tpu.dot_dimension_numbers<[1], [0], [0], [1], [0, 0, 1, 1], [], []>} : vector<64x128xbf16>, vector<128x128xbf16>, vector<64x128xf32> -> vector<64x128xf32>
    %68 = arith.addf %61, %67 : vector<64x128xf32>
    %c0_20 = arith.constant 0 : index
    %c0_21 = arith.constant 0 : index
    %69 = vector.load %arg6[%c0_20, %c0_21] : memref<1x128xf32, #tpu.memory_space<vmem>>, vector<1x128xf32>
    %70 = vector.broadcast %69 : vector<1x128xf32> to vector<64x128xf32>
    %71 = arith.addf %68, %70 : vector<64x128xf32>
    %cst_22 = arith.constant 0.000000e+00 : f32
    %72 = vector.broadcast %cst_22 : f32 to vector<64x128xf32>
    %73 = arith.maximumf %71, %72 : vector<64x128xf32>
    %74 = vector.shape_cast %73 : vector<64x128xf32> to vector<1x64x128xf32>
    %c0_23 = arith.constant 0 : index
    %c0_24 = arith.constant 0 : index
    %c0_25 = arith.constant 0 : index
    %75 = vector.load %arg7[%c0_23, %c0_24, %c0_25] : memref<1x64x128xf32, #tpu.memory_space<vmem>>, vector<1x64x128xf32>
    tpu.vector_store %arg7[%c0_23, %c0_24, %c0_25], %74 {strides = array<i32>} : memref<1x64x128xf32, #tpu.memory_space<vmem>>, vector<1x64x128xf32>,
    return
  }
  func.func @transform_0(%arg0: i32, %arg1: i32) -> (i32, i32, i32, i32) {
    %c0_i32 = arith.constant 0 : i32
    %c0_i32_0 = arith.constant 0 : i32
    %c0_i32_1 = arith.constant 0 : i32
    %c0_i32_2 = arith.constant 0 : i32
    return %arg0, %c0_i32, %c0_i32_0, %c0_i32_1 : i32, i32, i32, i32
  }
  func.func @transform_1(%arg0: i32, %arg1: i32) -> (i32, i32, i32) {
    %c0_i32 = arith.constant 0 : i32
    %c0_i32_0 = arith.constant 0 : i32
    %c0_i32_1 = arith.constant 0 : i32
    return %c0_i32, %c0_i32_0, %arg1 : i32, i32, i32
  }
  func.func @transform_2(%arg0: i32, %arg1: i32) -> (i32, i32, i32) {
    %c0_i32 = arith.constant 0 : i32
    %c0_i32_0 = arith.constant 0 : i32
    %c0_i32_1 = arith.constant 0 : i32
    return %arg0, %c0_i32, %c0_i32_0 : i32, i32, i32
  }
  func.func @transform_3(%arg0: i32, %arg1: i32) -> (i32, i32) {
    %c0_i32 = arith.constant 0 : i32
    %c0_i32_0 = arith.constant 0 : i32
    return %c0_i32, %arg1 : i32, i32
  }
  func.func @transform_4(%arg0: i32, %arg1: i32) -> (i32, i32) {
    %c0_i32 = arith.constant 0 : i32
    %c0_i32_0 = arith.constant 0 : i32
    return %c0_i32, %arg1 : i32, i32
  }
  func.func @transform_5(%arg0: i32, %arg1: i32) -> (i32, i32, i32) {
    %c0_i32 = arith.constant 0 : i32
    %c0_i32_0 = arith.constant 0 : i32
    return %arg0, %c0_i32, %arg1 : i32, i32, i32
  }
}

</mosaic_0001>

<bundles_post_ra>
// kernel: res_block_down.2
= control target key start
LH: loop header
LB: loop body
LE: loop exit
PB: predicated region body
PF: predicated region fallthrough
CT: control target
= control target key end

     0   :  { %s741_s12 = smov 0   ;;  %s743_s13 = smov 0   ;;  %s814_s0 = inlined_call_operand.vmem [shape: bf16[128,128], index: 0, kind: input, shape index: {}]   ;;  %s815_s1 = inlined_call_operand.vmem [shape: bf16[128,128], index: 1, kind: input, shape index: {}]   ;;  %s816_s2 = inlined_call_operand.vmem [shape: f32[1,128], index: 2, kind: input, shape index: {}]   ;;  %s817_s3 = inlined_call_operand.vmem [shape: bf16[128,128], index: 3, kind: output, shape index: {}]  }
   0x1   :  { %s745_s14 = smov 0  }
   0x2 LB: > { %s25_s15 = sadd.s32 1, %s715_s13  ;;  %p550_p0 = scmp.ge.s32.totalorder %s719_s14, 1  ;;  %s719_s14 = sphi %s745_s14, %s13_s14   ;;  %s715_s13 = sphi %s743_s13, %s819_s13   ;;  %s711_s12 = sphi %s741_s12, %s818_s12  }
   0x3   : > { %p27_p1 = scmp.ge.s32.totalorder %s25_s15, 2  ;;  %p169_p2 = scmp.lt.s32.totalorder %s719_s14, 3 }
   0x5   : > { %s821_s15 = smov (%p27_p1, %s25_s15), 0  ;;  %p170_p3 = pnand %p550_p0, %p169_p2 }
   0x6   : > { %v685_v0 = vld [vmem:[%s815_s1] sm:$0xff] (!%p170_p3)   ;;  %s551_s18 = sshll.u32 (!%p170_p3), %s711_s12, 3  ;;  %v686_v1 = vld [vmem:[%s815_s1 + $0x8] sm:$0xff] (!%p170_p3)   ;;  %v687_v2 = vld [vmem:[%s815_s1 + $0x10] sm:$0xff] (!%p170_p3)  }
   0x7   : > { %173 = sbr.rel (%p170_p3) target bundleno = 261 (0x105), region = 32  ;;  %p204_p4 = scmp.lt.s32.totalorder (!%p170_p3), %s551_s18, 15  ;;  %621 = vmatprep.subr.bf16.mxu0 (!%p170_p3), %v685_v0  ;;  %645 = vmatprep.subr.bf16.mxu1 (!%p170_p3), %v685_v0  ;;  %v688_v3 = vld [vmem:[%s815_s1 + $0x18] sm:$0xff] (!%p170_p3)   ;;  %v689_v6 = vld [vmem:[%s815_s1 + $0x20] sm:$0xff] (!%p170_p3)   ;;  %v690_v7 = vld [vmem:[%s815_s1 + $0x28] sm:$0xff] (!%p170_p3)  }
   0x8   : > { %622 = vmatpush3.bf16.msra.mxu0 (!%p170_p3), %v685_v0  ;;  %653 = vmatpush3.bf16.msra.mxu1 (!%p170_p3), %v685_v0  ;;  %v691_v8 = vld [vmem:[%s815_s1 + $0x30] sm:$0xff] (!%p170_p3)   ;;  %v692_v9 = vld [vmem:[%s815_s1 + $0x38] sm:$0xff] (!%p170_p3)   ;;  %v555_v12 = vld [vmem:[%s816_s2] ss:$0 sm:$0xff] (!%p170_p3) }
   0x9   : > { %623 = vmatprep.subr.bf16.mxu0 (!%p170_p3), %v686_v1  ;;  %646 = vmatprep.subr.bf16.mxu1 (!%p170_p3), %v686_v1 }
   0xc   : > { %624 = vmatpush3.bf16.msra.mxu0 (!%p170_p3), %v686_v1  ;;  %654 = vmatpush3.bf16.msra.mxu1 (!%p170_p3), %v686_v1 }
   0xd   : > { %625 = vmatprep.subr.bf16.mxu0 (!%p170_p3), %v687_v2  ;;  %647 = vmatprep.subr.bf16.mxu1 (!%p170_p3), %v687_v2 }
   0xe   : > { %s823_s18 = smov (!%p204_p4, %s551_s18), 15 }
   0xf   : > { %s552_s23 = sshll.u32 %s823_s18, 2 }
  0x10   : > { %s776_s26 = scalar_lea.vmem %s814_s0, %s552_s23  ;;  %626 = vmatpush3.bf16.msra.mxu0 %v687_v2  ;;  %655 = vmatpush3.bf16.msra.mxu1 %v687_v2  ;;  %s223_s17 = scalar_lea.vmem %s817_s3, %s552_s23 }
  0x11   : > { %v693_v4 = vld [vmem:[%s776_s26] sm:$0xff]   ;;  %v694_v5 = vld [vmem:[%s776_s26 + $0x10] sm:$0xff]   ;;  %627 = vmatprep.subr.bf16.mxu0 %v688_v3  ;;  %648 = vmatprep.subr.bf16.mxu1 %v688_v3  ;;  %v695_v10 = vld [vmem:[%s776_s26 + $0x8] sm:$0xff]  }
  0x12   : > { %637 = vmatprep.mubr.bf16.mxu0 %v693_v4  ;;  %641 = vmatprep.mubr.bf16.mxu1 %v694_v5  ;;  %v696_v11 = vld [vmem:[%s776_s26 + $0x18] sm:$0xff]  }
  0x14   : > { %628 = vmatpush3.bf16.msra.mxu0 %v688_v3  ;;  %656 = vmatpush3.bf16.msra.mxu1 %v688_v3 }
  0x15   : > { %629 = vmatprep.subr.bf16.mxu0 %v689_v6  ;;  %649 = vmatprep.subr.bf16.mxu1 %v689_v6 }
  0x18   : > { %630 = vmatpush3.bf16.msra.mxu0 %v689_v6  ;;  %657 = vmatpush3.bf16.msra.mxu1 %v689_v6 }
  0x19   : > { %631 = vmatprep.subr.bf16.mxu0 %v690_v7  ;;  %650 = vmatprep.subr.bf16.mxu1 %v690_v7 }
  0x1c   : > { %632 = vmatpush3.bf16.msra.mxu0 %v690_v7  ;;  %658 = vmatpush3.bf16.msra.mxu1 %v690_v7 }
  0x1d   : > { %633 = vmatprep.subr.bf16.mxu0 %v691_v8  ;;  %651 = vmatprep.subr.bf16.mxu1 %v691_v8 }
  0x20   : > { %634 = vmatpush3.bf16.msra.mxu0 %v691_v8  ;;  %659 = vmatpush3.bf16.msra.mxu1 %v691_v8 }
  0x21   : > { %635 = vmatprep.subr.bf16.mxu0 %v692_v9  ;;  %652 = vmatprep.subr.bf16.mxu1 %v692_v9 }
  0x24   : > { %636 = vmatpush3.bf16.msra.mxu0 %v692_v9  ;;  %660 = vmatpush3.bf16.msra.mxu1 %v692_v9 }
  0x27   : > { %638 = vmatmul.mubr.bf16.vlgmr.msra.gmra.mrb[0].mxu0 %v695_v10  ;;  %642 = vmatmul.mubr.bf16.vlgmr.msra.gmra.mrb[0].mxu1 %v696_v11 }
  0xfa   : > { %v639_v13 = vpop.f32.mrb[0].mxu0  ;;  %v643_v14 = vpop.f32.mrb[0].mxu1 }
  0xfb   : > { %v372_v15 = vadd.f32 %v639_v13, %v555_v12  ;;  %v388_v16 = vadd.f32 %v643_v14, %v555_v12  ;;  %v363_v17 = vpop.f32.mrb[1].mxu0  ;;  %v379_v18 = vpop.f32.mrb[1].mxu1 }
  0xfc   : > { %v364_v19 = vadd.f32 %v555_v12, %v363_v17  ;;  %v380_v20 = vadd.f32 %v555_v12, %v379_v18  ;;  %v640_v21 = vpop.f32.mrb[2].mxu0  ;;  %v644_v22 = vpop.f32.mrb[2].mxu1 }
  0xfd   : > { %v375_v23 = vadd.f32 %v640_v21, %v555_v12  ;;  %v391_v24 = vadd.f32 %v644_v22, %v555_v12  ;;  %v366_v25 = vpop.f32.mrb[3].mxu0  ;;  %v382_v26 = vpop.f32.mrb[3].mxu1  ;;  %v396_v29 = vmax.f32 %v372_v15, 0.0  ;;  %v400_v30 = vmax.f32 %v388_v16, 0.0 }
  0xfe   : > { %v367_v27 = vadd.f32 %v555_v12, %v366_v25  ;;  %v383_v28 = vadd.f32 %v555_v12, %v382_v26  ;;  %v394_v33 = vmax.f32 %v364_v19, 0.0  ;;  %v398_v34 = vmax.f32 %v380_v20, 0.0 }
  0xff   : > { %v397_v31 = vmax.f32 %v375_v23, 0.0  ;;  %v401_v32 = vmax.f32 %v391_v24, 0.0 }
 0x100   : > { %v395_v35 = vmax.f32 %v367_v27, 0.0  ;;  %v399_v36 = vmax.f32 %v383_v28, 0.0 }
 0x101   : > { %v594_v37 = vpack.c.bf16 %v397_v31, %v396_v29  ;;  %v604_v38 = vpack.c.bf16 %v401_v32, %v400_v30 }
 0x102   : > { %v589_v39 = vpack.c.bf16 %v395_v35, %v394_v33  ;;  %v599_v40 = vpack.c.bf16 %v399_v36, %v398_v34 }
 0x103   : > { %606 = vst [vmem:[%s223_s17 + $0x8] sm:$0xff] %v594_v37   ;;  %608 = vst [vmem:[%s223_s17 + $0x18] sm:$0xff] %v604_v38  }
 0x104   : > { %590 = vst [vmem:[%s223_s17] sm:$0xff] %v589_v39   ;;  %607 = vst [vmem:[%s223_s17 + $0x10] sm:$0xff] %v599_v40  }
 0x105 PF: > { %s13_s14 = sadd.s32 1, %s719_s14   ;;  %s818_s12 = smov %s715_s13 }
 0x106   : > { %p10_p5 = scmp.ge.s32.totalorder %s13_s14, 4   ;;  %s819_s13 = smov %s821_s15 }
 0x108   :  { %12 = sbr.rel (!%p10_p5) target bundleno = 2 (0x2), region = 68 }

// kernel: res_block_down.3
= control target key start
LH: loop header
LB: loop body
LE: loop exit
PB: predicated region body
PF: predicated region fallthrough
CT: control target
= control target key end

     0   :  { %s2916_s18 = smov 0   ;;  %s2918_s19 = smov 0   ;;  %s3503_s0 = inlined_call_operand.vmem [shape: bf16[2,10,10,128], index: 0, kind: input, shape index: {}]   ;;  %s3504_s1 = inlined_call_operand.vmem [shape: bf16[9,128,128], index: 1, kind: input, shape index: {}]   ;;  %s3505_s2 = inlined_call_operand.vmem [shape: bf16[2,64,128], index: 2, kind: input, shape index: {}]   ;;  %s3506_s3 = inlined_call_operand.vmem [shape: bf16[128,128], index: 3, kind: input, shape index: {}]   ;;  %s3507_s4 = inlined_call_operand.vmem [shape: f32[1,128], index: 4, kind: input, shape index: {}]   ;;  %s3508_s5 = inlined_call_operand.vmem [shape: f32[2,64,128], index: 5, kind: output, shape index: {}]  }
   0x1   :  { %s2920_s20 = smov 0  }
   0x2 LB: > { %s27_s21 = sadd.s32 1, %s2880_s19  ;;  %p2180_p0 = scmp.ge.s32.totalorder %s2884_s20, 1  ;;  %s2884_s20 = sphi %s2920_s20, %s15_s20   ;;  %s2880_s19 = sphi %s2918_s19, %s3514_s19   ;;  %s2876_s18 = sphi %s2916_s18, %s3513_s18  }
   0x3   : > { %p29_p1 = scmp.ge.s32.totalorder %s27_s21, 2  ;;  %p237_p2 = scmp.lt.s32.totalorder %s2884_s20, 3 }
   0x5   : > { %s3516_s21 = smov (%p29_p1, %s27_s21), 0  ;;  %p238_p3 = pnand %p2180_p0, %p237_p2 }
   0x6   : > { %v2769_v0 = vld [vmem:[%s3504_s1] sm:$0xff] (!%p238_p3)   ;;  %p284_p4 = scmp.lt.s32.totalorder (!%p238_p3), %s2876_s18, 1  ;;  %v2771_v2 = vld [vmem:[%s3504_s1 + $0x8] sm:$0xff] (!%p238_p3)   ;;  %v2773_v4 = vld [vmem:[%s3504_s1 + $0x10] sm:$0xff] (!%p238_p3)   ;;  %vm776_vm0 = vsmask.f32 (!%p238_p3), 3328 }
   0x7   : > { %241 = sbr.rel (%p238_p3) target bundleno = 399 (0x18f), region = 40  ;;  %v2770_v1 = vld [vmem:[%s3504_s1 + $0x100] sm:$0xff] (!%p238_p3)   ;;  %2432 = vmatprep.subr.bf16.mxu1 (!%p238_p3), %v2769_v0  ;;  %v2772_v3 = vld [vmem:[%s3504_s1 + $0x108] sm:$0xff] (!%p238_p3)   ;;  %v2774_v5 = vld [vmem:[%s3504_s1 + $0x110] sm:$0xff] (!%p238_p3)   ;;  %vm777_vm1 = vsmask.f32 (!%p238_p3), 7440 }
   0x8   : > { %2552 = vmatprep.subr.bf16.mxu0 (!%p238_p3), %v2770_v1  ;;  %2433 = vmatpush3.bf16.msra.mxu1 (!%p238_p3), %v2769_v0  ;;  %v2775_v6 = vld [vmem:[%s3504_s1 + $0x18] sm:$0xff] (!%p238_p3)   ;;  %v2777_v8 = vld [vmem:[%s3504_s1 + $0x20] sm:$0xff] (!%p238_p3)   ;;  %v2779_v10 = vld [vmem:[%s3504_s1 + $0x28] sm:$0xff] (!%p238_p3)   ;;  %vm1036_vm3 = vcmask (!%p238_p3), 1042432   ;;  %vm1037_vm4 = vcmask (!%p238_p3), 1046532  }
   0x9   : > { %2553 = vmatpush3.bf16.msra.mxu0 (!%p238_p3), %v2770_v1  ;;  %2434 = vmatprep.subr.bf16.mxu1 (!%p238_p3), %v2771_v2  ;;  %v2776_v7 = vld [vmem:[%s3504_s1 + $0x118] sm:$0xff] (!%p238_p3)   ;;  %v2778_v9 = vld [vmem:[%s3504_s1 + $0x120] sm:$0xff] (!%p238_p3)   ;;  %v2780_v13 = vld [vmem:[%s3504_s1 + $0x128] sm:$0xff] (!%p238_p3)  }
   0xa   : > { %2554 = vmatprep.subr.bf16.mxu0 (!%p238_p3), %v2772_v3  ;;  %v2781_v18 = vld [vmem:[%s3504_s1 + $0x30] sm:$0xff] (!%p238_p3)   ;;  %v2783_v24 = vld [vmem:[%s3504_s1 + $0x38] sm:$0xff] (!%p238_p3)   ;;  %vm3025_vm2 = vmor (!%p238_p3), %vm776_vm0, %vm777_vm1 }
   0xb   : > { %v2782_v19 = vld [vmem:[%s3504_s1 + $0x130] sm:$0xff] (!%p238_p3)   ;;  %v2784_v31 = vld [vmem:[%s3504_s1 + $0x138] sm:$0xff] (!%p238_p3)   ;;  %v2786_v47 = vld [vmem:[%s3506_s3] sm:$0xff] (!%p238_p3)  }
   0xc   : > { %2435 = vmatpush3.bf16.msra.mxu1 (!%p238_p3), %v2771_v2  ;;  %v2787_v49 = vld [vmem:[%s3504_s1 + $0x140] sm:$0xff] (!%p238_p3)   ;;  %v2789_v63 = vld [vmem:[%s3506_s3 + $0x8] sm:$0xff] (!%p238_p3)   ;;  %vm3165_vm5 = vmor (!%p238_p3), %vm1036_vm3, %vm1037_vm4 }
   0xd   : > { %2555 = vmatpush3.bf16.msra.mxu0 (!%p238_p3), %v2772_v3  ;;  %2436 = vmatprep.subr.bf16.mxu1 (!%p238_p3), %v2773_v4  ;;  %v2850_v39 = vld [vmem:[%s3504_s1 + $0xe0] sm:$0xff] (!%p238_p3)  }
   0xe   : > { %s3518_s18 = smov (!%p284_p4, %s2876_s18), 1  ;;  %2556 = vmatprep.subr.bf16.mxu0 %v2774_v5 }
   0xf   : > { %s2744_s13 = smul.u32 80, %s3518_s18  ;;  %s2310_s22 = sshll.u32 %s3518_s18, 5 }
  0x10   : > { %2437 = vmatpush3.bf16.msra.mxu1 %v2773_v4  ;;  %s3117_s9 = scalar_lea.vmem %s3505_s2, %s2310_s22  ;;  %s2311_s29 = sshll.u32 %s3518_s18, 6 }
  0x11   : > { %2557 = vmatpush3.bf16.msra.mxu0 %v2774_v5  ;;  %2438 = vmatprep.subr.bf16.mxu1 %v2775_v6  ;;  %s2970_s24 = scalar_lea.vmem %s3503_s0, %s2744_s13  ;;  %v2791_v5 = vld [vmem:[%s3506_s3 + $0x10] sm:$0xff]   ;;  %s3484_s7 = scalar_lea.vmem %s3508_s5, %s2311_s29 }
  0x12   : > { %2558 = vmatprep.subr.bf16.mxu0 %v2776_v7  ;;  %v2976_v11 = vld [vmem:[%s2970_s24] sm:$0xf]  ;;  %v2979_v12 = vld [vmem:[%s2970_s24 + $0x8] sm:$0xf]  ;;  %v2987_v15 = vld [vmem:[%s2970_s24 + $0xc] sm:$0x1] }
  0x13   : > { %v2186_v14 = vcombine.low %v2976_v11, %v2979_v12  ;;  %v2990_v16 = vld [vmem:[%s2970_s24 + $0x10] sm:$0xf]  ;;  %v2993_v17 = vld [vmem:[%s2970_s24 + $0x14] sm:$0x1]  ;;  %v3002_v20 = vld [vmem:[%s2970_s24 + $0x18] sm:$0xf] }
  0x14   : > { %2439 = vmatpush3.bf16.msra.mxu1 %v2775_v6  ;;  %v3005_v21 = vld [vmem:[%s2970_s24 + $0x1c] sm:$0x1]  ;;  %v794_v22 = vshrl.u32 %v2979_v12, 16  ;;  %v797_v23 = vshll.u32 %v2979_v12, 16  ;;  %v803_v25 = vshll.u32 %v2987_v15, 16  ;;  %v808_v26 = vshrl.u32 %v2990_v16, 16 }
  0x15   : > { %2559 = vmatpush3.bf16.msra.mxu0 %v2776_v7  ;;  %2440 = vmatprep.subr.bf16.mxu1 %v2777_v8  ;;  %v811_v27 = vshll.u32 %v2990_v16, 16  ;;  %v817_v28 = vshll.u32 %v2993_v17, 16  ;;  %v3020_v35 = vld [vmem:[%s2970_s24 + $0x20] sm:$0xf]  ;;  %v822_v37 = vshrl.u32 %v3002_v20, 16  ;;  %v825_v38 = vshll.u32 %v3002_v20, 16 }
  0x16   : > { %2560 = vmatprep.subr.bf16.mxu0 %v2778_v9  ;;  %2448 = vmatprep.mubr.bf16.mxu1 %v2186_v14  ;;  %v796_v29 = vrot.slane %v794_v22, 4  ;;  %v799_v30 = vrot.slane %v797_v23, 5  ;;  %v805_v32 = vrot.slane %v803_v25, 5  ;;  %v810_v33 = vrot.slane %v808_v26, 4  ;;  %v3031_v43 = vld [vmem:[%s2970_s24 + $0x24] sm:$0x1] }
  0x17   : > { %v813_v34 = vrot.slane %v811_v27, 5  ;;  %v819_v41 = vrot.slane %v817_v28, 5  ;;  %v831_v42 = vshll.u32 %v3005_v21, 16  ;;  %v824_v45 = vrot.slane %v822_v37, 4  ;;  %v2793_v14 = vld [vmem:[%s3506_s3 + $0x18] sm:$0xff]   ;;  %v2795_v37 = vld [vmem:[%s3506_s3 + $0x20] sm:$0xff]  }
  0x18   : > { %2441 = vmatpush3.bf16.msra.mxu1 %v2777_v8  ;;  %v800_v36 = vor.u32 %v799_v30, %v796_v29  ;;  %v827_v46 = vrot.slane %v825_v38, 5  ;;  %v836_v50 = vshrl.u32 %v3020_v35, 16  ;;  %v839_v51 = vshll.u32 %v3020_v35, 16  ;;  %v3098_v23 = vld [vmem:[%s2970_s24 + $0x30] sm:$0xf] }
  0x19   : > { %2561 = vmatpush3.bf16.msra.mxu0 %v2778_v9  ;;  %2442 = vmatprep.subr.bf16.mxu1 %v2779_v10  ;;  %v814_v40 = vor.u32 %v813_v34, %v810_v33  ;;  %v833_v54 = vrot.slane %v831_v42, 5  ;;  %v845_v55 = vshll.u32 %v3031_v43, 16  ;;  %v3052_v57 = vcombine.low %v2990_v16, %v3002_v20 }
  0x1a   : > { %2562 = vmatprep.subr.bf16.mxu0 %v2780_v13  ;;  %v801_v44 = vrot.slane %v800_v36, 4  ;;  %v828_v53 = vor.u32 %v827_v46, %v824_v45  ;;  %v838_v58 = vrot.slane %v836_v50, 4  ;;  %v841_v59 = vrot.slane %v839_v51, 5  ;;  %v2794_v45 = vld [vmem:[%s3504_s1 + $0x158] sm:$0xff]   ;;  %v3143_v50 = vld [vmem:[%s2970_s24 + $0x44] sm:$0x1] }
  0x1b   : > { %v815_v48 = vrot.slane %v814_v40, 4  ;;  %v847_v62 = vrot.slane %v845_v55, 5  ;;  %v1045_v3 = vrot.slane %v2987_v15, 5  ;;  %v2242_v6 = vcombine.low %v2979_v12, %v2990_v16  ;;  %v2798_v15 = vld [vmem:[%s3504_s1 + $0x168] sm:$0xff]  }
  0x1c   : > { %2443 = vmatpush3.bf16.msra.mxu1 %v2779_v10  ;;  %v3043_v52 = vsel %vm3025_vm2, %v801_v44, %v805_v32  ;;  %v829_v60 = vrot.slane %v828_v53, 4  ;;  %v842_v0 = vor.u32 %v841_v59, %v838_v58  ;;  %v2243_v7 = vcombine.low %v3002_v20, %v3020_v35  ;;  %v2790_v10 = vld [vmem:[%s3504_s1 + $0x148] sm:$0xff]   ;;  %v3127_v44 = vld [vmem:[%s2970_s24 + $0x38] sm:$0xf]  ;;  %v2805_v58 = vld [vmem:[%s3117_s9] sm:$0xff]  }
  0x1d   : > { %2563 = vmatpush3.bf16.msra.mxu0 %v2780_v13  ;;  %2444 = vmatprep.subr.bf16.mxu1 %v2781_v18  ;;  %v3048_v56 = vsel %vm3025_vm2, %v815_v48, %v819_v41  ;;  %v1049_v8 = vrot.slane %v2993_v17, 5  ;;  %v3084_v13 = vld [vmem:[%s2970_s24 + $0x28] sm:$0xf]  ;;  %v864_v28 = vshrl.u32 %v3098_v23, 16  ;;  %v867_v29 = vshll.u32 %v3098_v23, 16 }
  0x1e   : > { %2564 = vmatprep.subr.bf16.mxu0 %v2782_v19  ;;  %v2254_v61 = vcombine.low %v3043_v52, %v3048_v56  ;;  %v3061_v1 = vsel %vm3025_vm2, %v829_v60, %v833_v54  ;;  %v843_v2 = vrot.slane %v842_v0, 4  ;;  %v850_v22 = vshrl.u32 %v3084_v13, 16  ;;  %v3137_v48 = vld [vmem:[%s2970_s24 + $0x3c] sm:$0x1] }
  0x1f   : > { %v853_v25 = vshll.u32 %v3084_v13, 16  ;;  %v2223_v33 = vrot.slane %v2979_v12, 9  ;;  %v2224_v34 = vrot.slane %v2990_v16, 9  ;;  %v2244_v36 = vcombine.low %v3084_v13, %v3098_v23  ;;  %v2852_v12 = vld [vmem:[%s3504_s1 + $0xe8] sm:$0xff]   ;;  %v2851_v16 = vld [vmem:[%s3504_s1 + $0x220] sm:$0xff]  }
  0x20   : > { %2445 = vmatpush3.bf16.msra.mxu1 %v2781_v18  ;;  %2568 = vmatprep.mubr.bf16.mxu0 %v2254_v61  ;;  %v3068_v4 = vsel %vm3025_vm2, %v843_v2, %v847_v62  ;;  %v3091_v18 = vcombine.low %v3020_v35, %v3084_v13  ;;  %v852_v27 = vrot.slane %v850_v22, 4  ;;  %v866_v40 = vrot.slane %v864_v28, 4 }
  0x21   : > { %2565 = vmatpush3.bf16.msra.mxu0 %v2782_v19  ;;  %2446 = vmatprep.subr.bf16.mxu1 %v2783_v24  ;;  %v2255_v9 = vcombine.low %v3061_v1, %v3068_v4  ;;  %v3094_v19 = vld [vmem:[%s2970_s24 + $0x2c] sm:$0x1]  ;;  %v855_v32 = vrot.slane %v853_v25, 5  ;;  %v869_v41 = vrot.slane %v867_v29, 5  ;;  %v878_v53 = vshrl.u32 %v3127_v44, 16 }
  0x22   : > { %2566 = vmatprep.subr.bf16.mxu0 %v2784_v31  ;;  %v859_v26 = vshll.u32 %v3094_v19, 16  ;;  %v881_v54 = vshll.u32 %v3127_v44, 16  ;;  %v887_v55 = vshll.u32 %v3137_v48, 16  ;;  %v1349_v62 = vshll.u32 %v3143_v50, 16 }
  0x23   : > { %v856_v46 = vor.u32 %v855_v32, %v852_v27  ;;  %v870_v51 = vor.u32 %v869_v41, %v866_v40  ;;  %v880_v0 = vrot.slane %v878_v53, 4  ;;  %v780_v40 = vshrl.u32 %v2976_v11, 16 }
  0x24   : > { %2447 = vmatpush3.bf16.msra.mxu1 %v2783_v24  ;;  %v3101_v24 = vld [vmem:[%s2970_s24 + $0x34] sm:$0x1]  ;;  %v861_v38 = vrot.slane %v859_v26, 5  ;;  %v883_v2 = vrot.slane %v881_v54, 5  ;;  %v1351_v27 = vrot.slane %v1349_v62, 5  ;;  %v2803_v54 = vld [vmem:[%s3506_s3 + $0x38] sm:$0xff]  }
  0x25   : > { %2567 = vmatpush3.bf16.msra.mxu0 %v2784_v31  ;;  %2456 = vmatprep.subr.bf16.mxu1 %v2786_v47  ;;  %v873_v30 = vshll.u32 %v3101_v24, 16  ;;  %v2792_v31 = vld [vmem:[%s3504_s1 + $0x150] sm:$0xff]   ;;  %v857_v59 = vrot.slane %v856_v46, 4  ;;  %v2804_v62 = vld [vmem:[%s3504_s1 + $0x178] sm:$0xff]  }
  0x26   : > { %2576 = vmatprep.subr.bf16.mxu0 %v2787_v49  ;;  %v884_v29 = vor.u32 %v883_v2, %v880_v0  ;;  %v2225_v0 = vrot.slane %v3002_v20, 9  ;;  %v2808_v2 = vld [vmem:[%s3117_s9 + $0x8] sm:$0xff]  }
  0x27   : > { %2449 = vmatmul.mubr.bf16.vlgmr.msra.gmra.mrb[0].mxu1 %v3052_v57  ;;  %v875_v42 = vrot.slane %v873_v30, 5  ;;  %v3161_v22 = vsel %vm3025_vm2, %v857_v59, %v861_v38  ;;  %v1053_v59 = vrot.slane %v3005_v21, 5  ;;  %v2226_v21 = vrot.slane %v3020_v35, 9 }
  0x28   : > { %2457 = vmatpush3.bf16.msra.mxu1 %v2786_v47  ;;  %2569 = vmatmul.mubr.bf16.vlgmr.msra.gmra.mrb[0].mxu0 %v2255_v9  ;;  %v3134_v47 = vcombine.low %v3098_v23, %v3127_v44  ;;  %v2796_v9 = vld [vmem:[%s3504_s1 + $0x160] sm:$0xff]   ;;  %v885_v41 = vrot.slane %v884_v29, 4 }
  0x29   : > { %2458 = vmatprep.subr.bf16.mxu1 %v2789_v63  ;;  %2577 = vmatpush3.bf16.msra.mxu0 %v2787_v49  ;;  %v3140_v49 = vld [vmem:[%s2970_s24 + $0x40] sm:$0xf]  ;;  %v3237_v29 = vsel %vm3165_vm5, %v2225_v0, %v1053_v59  ;;  %v2820_v0 = vld [vmem:[%s3504_s1 + $0x70] sm:$0xff]  }
  0x2a   : > { %2578 = vmatprep.subr.bf16.mxu0 %v2790_v10  ;;  %2452 = vmatprep.mubr.bf16.mxu1 %v3091_v18  ;;  %v1340_v60 = vshrl.u32 %v3140_v49, 16  ;;  %v1343_v61 = vshll.u32 %v3140_v49, 16  ;;  %v2245_v38 = vcombine.low %v3127_v44, %v3140_v49 }
  0x2c   : > { %2459 = vmatpush3.bf16.msra.mxu1 %v2789_v63  ;;  %v871_v63 = vrot.slane %v870_v51, 4  ;;  %v1342_v25 = vrot.slane %v1340_v60, 4  ;;  %v1345_v26 = vrot.slane %v1343_v61, 5  ;;  %v3189_v51 = vsel %vm3165_vm5, %v2224_v34, %v1049_v8 }
  0x2d   : > { %2460 = vmatprep.subr.bf16.mxu1 %v2791_v5  ;;  %2579 = vmatpush3.bf16.msra.mxu0 %v2790_v10  ;;  %v2797_v10 = vld [vmem:[%s3506_s3 + $0x28] sm:$0xff]   ;;  %v782_v34 = vrot.slane %v780_v40, 4  ;;  %v1057_v60 = vrot.slane %v3031_v43, 5  ;;  %v2227_v43 = vrot.slane %v3084_v13, 9 }
  0x2e   : > { %2580 = vmatprep.subr.bf16.mxu0 %v2792_v31  ;;  %v1346_v32 = vor.u32 %v1345_v26, %v1342_v25  ;;  %v2819_v26 = vld [vmem:[%s3117_s9 + $0x10] sm:$0xff]  }
  0x2f   : > { %2453 = vmatmul.mubr.bf16.gmra.mrb[4].mxu1 %v3134_v47 }
  0x30   : > { %2461 = vmatpush3.bf16.msra.mxu1 %v2791_v5  ;;  %v889_v5 = vrot.slane %v887_v55, 5  ;;  %2472 = vmatprep.mubr.bf16.mxu1 %v2805_v58  ;;  %v1347_v46 = vrot.slane %v1346_v32, 4  ;;  %v2801_v58 = vld [vmem:[%s3504_s1 + $0x170] sm:$0xff]  }
  0x31   : > { %2462 = vmatprep.subr.bf16.mxu1 %v2793_v14  ;;  %2581 = vmatpush3.bf16.msra.mxu0 %v2792_v31  ;;  %v783_v31 = vshll.u32 %v2976_v11, 16  ;;  %v2811_v32 = vld [vmem:[%s3504_s1 + $0x50] sm:$0xff]  }
  0x32   : > { %2582 = vmatprep.subr.bf16.mxu0 %v2794_v45  ;;  %v3196_v53 = vsel %vm3025_vm2, %v885_v41, %v889_v5  ;;  %v3203_v17 = vsel %vm3025_vm2, %v1347_v46, %v1351_v27  ;;  %v1061_v5 = vrot.slane %v3094_v19, 5  ;;  %v2809_v19 = vld [vmem:[%s3504_s1 + $0x48] sm:$0xff]   ;;  %v2229_v46 = vrot.slane %v3127_v44, 9 }
  0x33   : > { %v2257_v8 = vcombine.low %v3196_v53, %v3203_v17 }
  0x34   : > { %2463 = vmatpush3.bf16.msra.mxu1 %v2793_v14  ;;  %v3171_v14 = vsel %vm3025_vm2, %v871_v63, %v875_v42  ;;  %v3183_v42 = vsel %vm3165_vm5, %v2223_v33, %v1045_v3  ;;  %v3206_v3 = vld [vmem:[%s2970_s24 + $0x4] sm:$0x1]  ;;  %v3254_v40 = vsel %vm3165_vm5, %v2227_v43, %v1061_v5  ;;  %v2824_v5 = vld [vmem:[%s3504_s1 + $0x1b8] sm:$0xff]  }
  0x35   : > { %2464 = vmatprep.subr.bf16.mxu1 %v2795_v37  ;;  %v2256_v30 = vcombine.low %v3161_v22, %v3171_v14  ;;  %2583 = vmatpush3.bf16.msra.mxu0 %v2794_v45  ;;  %v2267_v33 = vcombine.low %v3183_v42, %v3189_v51  ;;  %v785_v45 = vrot.slane %v783_v31, 5  ;;  %v789_v55 = vshll.u32 %v3206_v3, 16  ;;  %v2806_v63 = vld [vmem:[%s3504_s1 + $0x40] sm:$0xff]  }
  0x36   : > { %2584 = vmatprep.subr.bf16.mxu0 %v2796_v9  ;;  %v2825_v43 = vld [vmem:[%s3504_s1 + $0x80] sm:$0xff]  }
  0x37   : > { %2572 = vmatprep.mubr.bf16.mxu0 %v2256_v30  ;;  %v786_v61 = vor.u32 %v785_v45, %v782_v34  ;;  %v791_v27 = vrot.slane %v789_v55, 5  ;;  %v3241_v30 = vsel %vm3165_vm5, %v2226_v21, %v1057_v60  ;;  %v2810_v34 = vld [vmem:[%s3504_s1 + $0x188] sm:$0xff]   ;;  %v2813_v55 = vld [vmem:[%s3504_s1 + $0x58] sm:$0xff]   ;;  %v2815_v60 = vld [vmem:[%s3504_s1 + $0x60] sm:$0xff]  }
  0x38   : > { %2465 = vmatpush3.bf16.msra.mxu1 %v2795_v37  ;;  %v2800_v37 = vld [vmem:[%s3506_s3 + $0x30] sm:$0xff]   ;;  %2573 = vmatmul.mubr.bf16.gmra.mrb[4].mxu0 %v2257_v8  ;;  %v2268_v31 = vcombine.low %v3237_v29, %v3241_v30  ;;  %v2266_v8 = vrot.slane %v3140_v49, 9  ;;  %v2818_v21 = vld [vmem:[%s3504_s1 + $0x1a8] sm:$0xff]  }
  0x39   : > { %2466 = vmatprep.subr.bf16.mxu1 %v2797_v10  ;;  %2585 = vmatpush3.bf16.msra.mxu0 %v2796_v9  ;;  %v2228_v9 = vrot.slane %v3098_v23, 9  ;;  %v787_v25 = vrot.slane %v786_v61, 4  ;;  %v2814_v61 = vld [vmem:[%s3504_s1 + $0x198] sm:$0xff]  }
  0x3a   : > { %2586 = vmatprep.subr.bf16.mxu0 %v2798_v15  ;;  %2592 = vmatprep.mubr.bf16.mxu0 %v2267_v33  ;;  %v1486_v33 = vrot.slane %v3143_v50, 5 }
  0x3c   : > { %2467 = vmatpush3.bf16.msra.mxu1 %v2797_v10  ;;  %v1065_v10 = vrot.slane %v3101_v24, 5  ;;  %v2807_v24 = vld [vmem:[%s3504_s1 + $0x180] sm:$0xff]  }
  0x3d   : > { %2468 = vmatprep.subr.bf16.mxu1 %v2800_v37  ;;  %2587 = vmatpush3.bf16.msra.mxu0 %v2798_v15  ;;  %v792_v15 = vsel %vm3025_vm2, %v787_v25, %v791_v27  ;;  %v2222_v25 = vrot.slane %v2976_v11, 9  ;;  %v1041_v27 = vrot.slane %v3206_v3, 5  ;;  %v2829_v11 = vld [vmem:[%s3504_s1 + $0x90] sm:$0xff]  }
  0x3e   : > { %2588 = vmatprep.subr.bf16.mxu0 %v2801_v58  ;;  %v3258_v41 = vsel %vm3165_vm5, %v2228_v9, %v1065_v10  ;;  %v2211_v9 = vcombine.low %v3048_v56, %v3061_v1  ;;  %v3326_v10 = vcombine.low %v3068_v4, %v3161_v22  ;;  %v2826_v56 = vld [vmem:[%s3504_s1 + $0x1c0] sm:$0xff]   ;;  %v2828_v4 = vld [vmem:[%s3504_s1 + $0x1c8] sm:$0xff]   ;;  %v3347_v22 = vcombine.low %v3171_v14, %v3196_v53 }
  0x3f   : > { %v2269_v45 = vcombine.low %v3254_v40, %v3258_v41  ;;  %v1042_v1 = vsel %vm3165_vm5, %v2222_v25, %v1041_v27  ;;  %v2833_v14 = vld [vmem:[%s3504_s1 + $0xa0] sm:$0xff]  }
  0x40   : > { %2469 = vmatpush3.bf16.msra.mxu1 %v2800_v37  ;;  %v1069_v37 = vrot.slane %v3137_v48, 5  ;;  %v2210_v48 = vcombine.low %v792_v15, %v3043_v52  ;;  %v2812_v52 = vld [vmem:[%s3504_s1 + $0x190] sm:$0xff]   ;;  %v2230_v3 = vcombine.low %v1042_v1, %v3183_v42  ;;  %v2832_v42 = vld [vmem:[%s3504_s1 + $0x1d8] sm:$0xff]   ;;  %v2834_v53 = vld [vmem:[%s3504_s1 + $0x1e0] sm:$0xff]  }
  0x41   : > { %2470 = vmatprep.subr.bf16.mxu1 %v2803_v54  ;;  %2589 = vmatpush3.bf16.msra.mxu0 %v2801_v58  ;;  %v3284_v58 = vsel %vm3165_vm5, %v2266_v8, %v1486_v33  ;;  %v2840_v8 = vld [vmem:[%s3504_s1 + $0xb8] sm:$0xff]   ;;  %v2838_v33 = vld [vmem:[%s3504_s1 + $0x1f0] sm:$0xff]   ;;  %v2307_v27 = vld [vmem:[%s3507_s4] ss:$0 sm:$0xff] }
  0x42   : > { %2590 = vmatprep.subr.bf16.mxu0 %v2804_v62  ;;  %v3280_v50 = vsel %vm3165_vm5, %v2229_v46, %v1069_v37  ;;  %v2836_v46 = vld [vmem:[%s3504_s1 + $0x1e8] sm:$0xff]  }
  0x43   : > { %v2270_v59 = vcombine.low %v3280_v50, %v3284_v58 }
  0x44   : > { %2471 = vmatpush3.bf16.msra.mxu1 %v2803_v54  ;;  %v2822_v54 = vld [vmem:[%s3117_s9 + $0x18] sm:$0xff]  }
  0x45   : > { %2480 = vmatprep.subr.bf16.mxu1 %v2806_v63  ;;  %2591 = vmatpush3.bf16.msra.mxu0 %v2804_v62  ;;  %v2817_v62 = vld [vmem:[%s3504_s1 + $0x68] sm:$0xff]  }
  0x46   : > { %2600 = vmatprep.subr.bf16.mxu0 %v2807_v24 }
  0x47   : > { %2473 = vmatmul.mubr.bf16.vlgmr.msra.gmra.mrb[0].mxu1 %v2808_v2  ;;  %v2823_v2 = vld [vmem:[%s3504_s1 + $0x78] sm:$0xff]  }
  0x48   : > { %2481 = vmatpush3.bf16.msra.mxu1 %v2806_v63  ;;  %2476 = vmatprep.mubr.bf16.mxu1 %v2819_v26  ;;  %v2816_v63 = vld [vmem:[%s3504_s1 + $0x1a0] sm:$0xff]   ;;  %v2827_v26 = vld [vmem:[%s3504_s1 + $0x88] sm:$0xff]  }
  0x49   : > { %2482 = vmatprep.subr.bf16.mxu1 %v2809_v19  ;;  %2593 = vmatmul.mubr.bf16.vlgmr.msra.gmra.mrb[0].mxu0 %v2268_v31  ;;  %v2837_v31 = vld [vmem:[%s3504_s1 + $0xb0] sm:$0xff]  }
  0x4a   : > { %2601 = vmatpush3.bf16.msra.mxu0 %v2807_v24  ;;  %2596 = vmatprep.mubr.bf16.mxu0 %v2269_v45  ;;  %v3355_v24 = vld [vmem:[%s2970_s24 + $0x48] sm:$0xf] }
  0x4b   : > { %2602 = vmatprep.subr.bf16.mxu0 %v2810_v34  ;;  %v1744_v37 = vshrl.u32 %v3355_v24, 16  ;;  %v1747_v15 = vshll.u32 %v3355_v24, 16 }
  0x4c   : > { %2483 = vmatpush3.bf16.msra.mxu1 %v2809_v19  ;;  %v2831_v19 = vld [vmem:[%s3504_s1 + $0x98] sm:$0xff]  }
  0x4d   : > { %2484 = vmatprep.subr.bf16.mxu1 %v2811_v32  ;;  %v1746_v45 = vrot.slane %v1744_v37, 4 }
  0x4e   : > { %2603 = vmatpush3.bf16.msra.mxu0 %v2810_v34  ;;  %v2842_v34 = vld [vmem:[%s3504_s1 + $0xc0] sm:$0xff]  }
  0x4f   : > { %2477 = vmatmul.mubr.bf16.gmra.mrb[4].mxu1 %v2822_v54  ;;  %2604 = vmatprep.subr.bf16.mxu0 %v2812_v52  ;;  %v1749_v54 = vrot.slane %v1747_v15, 5 }
  0x50   : > { %2485 = vmatpush3.bf16.msra.mxu1 %v2811_v32  ;;  %2496 = vmatprep.mubr.bf16.mxu1 %v2210_v48  ;;  %v2830_v32 = vld [vmem:[%s3504_s1 + $0x1d0] sm:$0xff]   ;;  %v2841_v48 = vld [vmem:[%s3504_s1 + $0x1f8] sm:$0xff]  }
  0x51   : > { %2486 = vmatprep.subr.bf16.mxu1 %v2813_v55  ;;  %2597 = vmatmul.mubr.bf16.gmra.mrb[4].mxu0 %v2270_v59  ;;  %v3403_v59 = vcombine.low %v3241_v30, %v3254_v40  ;;  %v2845_v40 = vld [vmem:[%s3504_s1 + $0x208] sm:$0xff]  }
  0x52   : > { %2605 = vmatpush3.bf16.msra.mxu0 %v2812_v52  ;;  %2616 = vmatprep.mubr.bf16.mxu0 %v3052_v57  ;;  %v2821_v57 = vld [vmem:[%s3504_s1 + $0x1b0] sm:$0xff]   ;;  %v2231_v52 = vcombine.low %v3189_v51, %v3237_v29 }
  0x53   : > { %2606 = vmatprep.subr.bf16.mxu0 %v2814_v61  ;;  %v2846_v51 = vld [vmem:[%s3504_s1 + $0xd0] sm:$0xff]  }
  0x54   : > { %2487 = vmatpush3.bf16.msra.mxu1 %v2813_v55  ;;  %v3397_v55 = vld [vmem:[%s2970_s24 + $0x4c] sm:$0x1] }
  0x55   : > { %2488 = vmatprep.subr.bf16.mxu1 %v2815_v60  ;;  %v1884_v25 = vrot.slane %v3397_v55, 5 }
  0x56   : > { %2607 = vmatpush3.bf16.msra.mxu0 %v2814_v61  ;;  %v1750_v61 = vor.u32 %v1749_v54, %v1746_v45 }
  0x57   : > { %2608 = vmatprep.subr.bf16.mxu0 %v2816_v63 }
  0x58   : > { %2489 = vmatpush3.bf16.msra.mxu1 %v2815_v60  ;;  %v2844_v60 = vld [vmem:[%s3504_s1 + $0xc8] sm:$0xff]   ;;  %v1751_v29 = vrot.slane %v1750_v61, 4 }
  0x59   : > { %2490 = vmatprep.subr.bf16.mxu1 %v2817_v62 }
  0x5a   : > { %2609 = vmatpush3.bf16.msra.mxu0 %v2816_v63  ;;  %v2843_v63 = vld [vmem:[%s3504_s1 + $0x200] sm:$0xff]  }
  0x5b   : > { %2610 = vmatprep.subr.bf16.mxu0 %v2818_v21 }
  0x5c   : > { %2491 = vmatpush3.bf16.msra.mxu1 %v2817_v62  ;;  %v1753_v62 = vshll.u32 %v3397_v55, 16 }
  0x5d   : > { %2492 = vmatprep.subr.bf16.mxu1 %v2820_v0 }
  0x5e   : > { %2611 = vmatpush3.bf16.msra.mxu0 %v2818_v21  ;;  %v1755_v30 = vrot.slane %v1753_v62, 5  ;;  %v2848_v21 = vld [vmem:[%s3504_s1 + $0xd8] sm:$0xff]  }
  0x5f   : > { %2612 = vmatprep.subr.bf16.mxu0 %v2821_v57 }
  0x60   : > { %2493 = vmatpush3.bf16.msra.mxu1 %v2820_v0  ;;  %v2233_v0 = vcombine.low %v3258_v41, %v3280_v50  ;;  %v2849_v50 = vld [vmem:[%s3504_s1 + $0x218] sm:$0xff]  }
  0x61   : > { %2494 = vmatprep.subr.bf16.mxu1 %v2823_v2 }
  0x62   : > { %2613 = vmatpush3.bf16.msra.mxu0 %v2821_v57  ;;  %v2847_v57 = vld [vmem:[%s3504_s1 + $0x210] sm:$0xff]  }
  0x63   : > { %2614 = vmatprep.subr.bf16.mxu0 %v2824_v5 }
  0x64   : > { %2495 = vmatpush3.bf16.msra.mxu1 %v2823_v2  ;;  %v1756_v2 = vsel %vm3025_vm2, %v1751_v29, %v1755_v30 }
  0x65   : > { %2504 = vmatprep.subr.bf16.mxu1 %v2825_v43  ;;  %v2288_v41 = vcombine.low %v3203_v17, %v1756_v2  ;;  %v2853_v17 = vld [vmem:[%s3504_s1 + $0x228] sm:$0xff]  }
  0x66   : > { %2615 = vmatpush3.bf16.msra.mxu0 %v2824_v5  ;;  %v2855_v5 = vld [vmem:[%s3504_s1 + $0x230] sm:$0xff]  }
  0x67   : > { %2497 = vmatmul.mubr.bf16.vlgmr.msra.gmra.mrb[0].mxu1 %v2211_v9  ;;  %2624 = vmatprep.subr.bf16.mxu0 %v2826_v56 }
  0x68   : > { %2505 = vmatpush3.bf16.msra.mxu1 %v2825_v43  ;;  %2500 = vmatprep.mubr.bf16.mxu1 %v3326_v10  ;;  %v2856_v43 = vld [vmem:[%s3504_s1 + $0xf8] sm:$0xff]  }
  0x69   : > { %2506 = vmatprep.subr.bf16.mxu1 %v2827_v26  ;;  %2617 = vmatmul.mubr.bf16.vlgmr.msra.gmra.mrb[0].mxu0 %v3091_v18  ;;  %v2279_v18 = vcombine.low %v3140_v49, %v3355_v24 }
  0x6a   : > { %2625 = vmatpush3.bf16.msra.mxu0 %v2826_v56  ;;  %2620 = vmatprep.mubr.bf16.mxu0 %v3134_v47  ;;  %v2835_v47 = vld [vmem:[%s3504_s1 + $0xa8] sm:$0xff]  }
  0x6b   : > { %2626 = vmatprep.subr.bf16.mxu0 %v2828_v4 }
  0x6c   : > { %2507 = vmatpush3.bf16.msra.mxu1 %v2827_v26 }
  0x6d   : > { %2508 = vmatprep.subr.bf16.mxu1 %v2829_v11 }
  0x6e   : > { %2627 = vmatpush3.bf16.msra.mxu0 %v2828_v4 }
  0x6f   : > { %2501 = vmatmul.mubr.bf16.gmra.mrb[4].mxu1 %v3347_v22  ;;  %2628 = vmatprep.subr.bf16.mxu0 %v2830_v32 }
  0x70   : > { %2509 = vmatpush3.bf16.msra.mxu1 %v2829_v11  ;;  %2520 = vmatprep.mubr.bf16.mxu1 %v2230_v3 }
  0x71   : > { %2510 = vmatprep.subr.bf16.mxu1 %v2831_v19  ;;  %2621 = vmatmul.mubr.bf16.gmra.mrb[4].mxu0 %v2279_v18 }
  0x72   : > { %2629 = vmatpush3.bf16.msra.mxu0 %v2830_v32  ;;  %2640 = vmatprep.mubr.bf16.mxu0 %v2211_v9  ;;  %v2857_v9 = vld [vmem:[%s3504_s1 + $0x238] sm:$0xff]  }
  0x73   : > { %2630 = vmatprep.subr.bf16.mxu0 %v2832_v42 }
  0x74   : > { %2511 = vmatpush3.bf16.msra.mxu1 %v2831_v19 }
  0x75   : > { %2512 = vmatprep.subr.bf16.mxu1 %v2833_v14 }
  0x76   : > { %2631 = vmatpush3.bf16.msra.mxu0 %v2832_v42 }
  0x77   : > { %2632 = vmatprep.subr.bf16.mxu0 %v2834_v53 }
  0x78   : > { %2513 = vmatpush3.bf16.msra.mxu1 %v2833_v14 }
  0x79   : > { %2514 = vmatprep.subr.bf16.mxu1 %v2835_v47 }
  0x7a   : > { %2633 = vmatpush3.bf16.msra.mxu0 %v2834_v53 }
  0x7b   : > { %2634 = vmatprep.subr.bf16.mxu0 %v2836_v46 }
  0x7c   : > { %2515 = vmatpush3.bf16.msra.mxu1 %v2835_v47 }
  0x7d   : > { %2516 = vmatprep.subr.bf16.mxu1 %v2837_v31 }
  0x7e   : > { %2635 = vmatpush3.bf16.msra.mxu0 %v2836_v46 }
  0x7f   : > { %2636 = vmatprep.subr.bf16.mxu0 %v2838_v33 }
  0x80   : > { %2517 = vmatpush3.bf16.msra.mxu1 %v2837_v31 }
  0x81   : > { %2518 = vmatprep.subr.bf16.mxu1 %v2840_v8 }
  0x82   : > { %2637 = vmatpush3.bf16.msra.mxu0 %v2838_v33 }
  0x83   : > { %2638 = vmatprep.subr.bf16.mxu0 %v2841_v48 }
  0x84   : > { %2519 = vmatpush3.bf16.msra.mxu1 %v2840_v8 }
  0x85   : > { %2528 = vmatprep.subr.bf16.mxu1 %v2842_v34 }
  0x86   : > { %2639 = vmatpush3.bf16.msra.mxu0 %v2841_v48 }
  0x87   : > { %2521 = vmatmul.mubr.bf16.vlgmr.msra.gmra.mrb[0].mxu1 %v2231_v52  ;;  %2648 = vmatprep.subr.bf16.mxu0 %v2843_v63 }
  0x88   : > { %2529 = vmatpush3.bf16.msra.mxu1 %v2842_v34  ;;  %2524 = vmatprep.mubr.bf16.mxu1 %v3403_v59 }
  0x89   : > { %2530 = vmatprep.subr.bf16.mxu1 %v2844_v60  ;;  %2641 = vmatmul.mubr.bf16.vlgmr.msra.gmra.mrb[0].mxu0 %v3326_v10  ;;  %v2297_v10 = vrot.slane %v3355_v24, 9 }
  0x8a   : > { %2649 = vmatpush3.bf16.msra.mxu0 %v2843_v63  ;;  %2644 = vmatprep.mubr.bf16.mxu0 %v3347_v22 }
  0x8b   : > { %2650 = vmatprep.subr.bf16.mxu0 %v2845_v40  ;;  %v1885_v26 = vsel %vm3165_vm5, %v2297_v10, %v1884_v25 }
  0x8c   : > { %2531 = vmatpush3.bf16.msra.mxu1 %v2844_v60  ;;  %v2298_v20 = vcombine.low %v3284_v58, %v1885_v26 }
  0x8d   : > { %2532 = vmatprep.subr.bf16.mxu1 %v2846_v51 }
  0x8e   : > { %2651 = vmatpush3.bf16.msra.mxu0 %v2845_v40 }
  0x8f   : > { %2525 = vmatmul.mubr.bf16.gmra.mrb[4].mxu1 %v2233_v0  ;;  %2652 = vmatprep.subr.bf16.mxu0 %v2847_v57 }
  0x90   : > { %2533 = vmatpush3.bf16.msra.mxu1 %v2846_v51  ;;  %2544 = vmatprep.mubr.bf16.mxu1 %v2242_v6  ;;  %v2854_v6 = vld [vmem:[%s3504_s1 + $0xf0] sm:$0xff]  }
  0x91   : > { %2534 = vmatprep.subr.bf16.mxu1 %v2848_v21  ;;  %2645 = vmatmul.mubr.bf16.gmra.mrb[4].mxu0 %v2288_v41 }
  0x92   : > { %2653 = vmatpush3.bf16.msra.mxu0 %v2847_v57  ;;  %2664 = vmatprep.mubr.bf16.mxu0 %v2231_v52 }
  0x93   : > { %2654 = vmatprep.subr.bf16.mxu0 %v2849_v50 }
  0x94   : > { %2535 = vmatpush3.bf16.msra.mxu1 %v2848_v21 }
  0x95   : > { %2536 = vmatprep.subr.bf16.mxu1 %v2850_v39 }
  0x96   : > { %2655 = vmatpush3.bf16.msra.mxu0 %v2849_v50 }
  0x97   : > { %2656 = vmatprep.subr.bf16.mxu0 %v2851_v16 }
  0x98   : > { %2537 = vmatpush3.bf16.msra.mxu1 %v2850_v39 }
  0x99   : > { %2538 = vmatprep.subr.bf16.mxu1 %v2852_v12 }
  0x9a   : > { %2657 = vmatpush3.bf16.msra.mxu0 %v2851_v16 }
  0x9b   : > { %2658 = vmatprep.subr.bf16.mxu0 %v2853_v17 }
  0x9c   : > { %2539 = vmatpush3.bf16.msra.mxu1 %v2852_v12 }
  0x9d   : > { %2540 = vmatprep.subr.bf16.mxu1 %v2854_v6 }
  0x9e   : > { %2659 = vmatpush3.bf16.msra.mxu0 %v2853_v17 }
  0x9f   : > { %2660 = vmatprep.subr.bf16.mxu0 %v2855_v5 }
  0xa0   : > { %2541 = vmatpush3.bf16.msra.mxu1 %v2854_v6 }
  0xa1   : > { %2542 = vmatprep.subr.bf16.mxu1 %v2856_v43 }
  0xa2   : > { %2661 = vmatpush3.bf16.msra.mxu0 %v2855_v5 }
  0xa3   : > { %2662 = vmatprep.subr.bf16.mxu0 %v2857_v9 }
  0xa4   : > { %2543 = vmatpush3.bf16.msra.mxu1 %v2856_v43 }
  0xa6   : > { %2663 = vmatpush3.bf16.msra.mxu0 %v2857_v9 }
  0xa7   : > { %2545 = vmatmul.mubr.bf16.vlgmr.msra.gmra.mrb[0].mxu1 %v2243_v7 }
  0xa8   : > { %2548 = vmatprep.mubr.bf16.mxu1 %v2244_v36 }
  0xa9   : > { %2665 = vmatmul.mubr.bf16.vlgmr.msra.gmra.mrb[0].mxu0 %v3403_v59 }
  0xaa   : > { %2668 = vmatprep.mubr.bf16.mxu0 %v2233_v0 }
  0xaf   : > { %2549 = vmatmul.mubr.bf16.gmra.mrb[4].mxu1 %v2245_v38 }
  0xb1   : > { %2669 = vmatmul.mubr.bf16.gmra.mrb[4].mxu0 %v2298_v20 }
 0x17a   : > { %v2546_v35 = vpop.f32.mrb[0].mxu1 }
 0x17b   : > { %v1300_v7 = vpop.f32.mrb[1].mxu1 }
 0x17c   : > { %v2547_v13 = vpop.f32.mrb[2].mxu1  ;;  %v2666_v36 = vpop.f32.mrb[0].mxu0 }
 0x17d   : > { %v1303_v23 = vpop.f32.mrb[3].mxu1  ;;  %v2672_v56 = vadd.f32 %v2666_v36, %v2546_v35  ;;  %v1971_v28 = vpop.f32.mrb[1].mxu0 }
 0x17e   : > { %v2673_v11 = vadd.f32 %v1971_v28, %v1300_v7  ;;  %v2667_v1 = vpop.f32.mrb[2].mxu0 }
 0x17f   : > { %v2019_v4 = vadd.f32 %v2672_v56, %v2307_v27  ;;  %v2674_v44 = vadd.f32 %v2667_v1, %v2547_v13  ;;  %v1974_v49 = vpop.f32.mrb[3].mxu0 }
 0x180   : > { %v2017_v58 = vadd.f32 %v2673_v11, %v2307_v27  ;;  %v2675_v22 = vadd.f32 %v1974_v49, %v1303_v23 }
 0x181   : > { %v2027_v19 = vmax.f32 %v2019_v4, 0.0  ;;  %v2020_v24 = vadd.f32 %v2674_v44, %v2307_v27 }
 0x182   : > { %v2550_v38 = vpop.f32.mrb[4].mxu1  ;;  %v2025_v18 = vmax.f32 %v2017_v58, 0.0  ;;  %v2018_v14 = vadd.f32 %v2675_v22, %v2307_v27 }
 0x183   : > { %v1316_v3 = vpop.f32.mrb[5].mxu1  ;;  %2035 = vst [vmem:[%s3484_s7 + $0x10] sm:$0xff] %v2027_v19  ;;  %v2028_v47 = vmax.f32 %v2020_v24, 0.0 }
 0x184   : > { %v2551_v32 = vpop.f32.mrb[6].mxu1  ;;  %2033 = vst [vmem:[%s3484_s7] sm:$0xff] %v2025_v18  ;;  %v2026_v53 = vmax.f32 %v2018_v14, 0.0  ;;  %v2670_v31 = vpop.f32.mrb[4].mxu0 }
 0x185   : > { %v1319_v42 = vpop.f32.mrb[7].mxu1  ;;  %2036 = vst [vmem:[%s3484_s7 + $0x18] sm:$0xff] %v2028_v47  ;;  %v2676_v46 = vadd.f32 %v2670_v31, %v2550_v38  ;;  %v1987_v37 = vpop.f32.mrb[5].mxu0 }
 0x186   : > { %2034 = vst [vmem:[%s3484_s7 + $0x8] sm:$0xff] %v2026_v53  ;;  %v2677_v15 = vadd.f32 %v1987_v37, %v1316_v3  ;;  %v2671_v8 = vpop.f32.mrb[6].mxu0 }
 0x187   : > { %v2023_v33 = vadd.f32 %v2676_v46, %v2307_v27  ;;  %v2678_v34 = vadd.f32 %v2671_v8, %v2551_v32  ;;  %v1990_v45 = vpop.f32.mrb[7].mxu0 }
 0x188   : > { %v2021_v54 = vadd.f32 %v2677_v15, %v2307_v27  ;;  %v2679_v48 = vadd.f32 %v1990_v45, %v1319_v42 }
 0x189   : > { %v2031_v55 = vmax.f32 %v2023_v33, 0.0  ;;  %v2024_v52 = vadd.f32 %v2678_v34, %v2307_v27 }
 0x18a   : > { %v2029_v59 = vmax.f32 %v2021_v54, 0.0  ;;  %v2022_v60 = vadd.f32 %v2679_v48, %v2307_v27 }
 0x18b   : > { %2039 = vst [vmem:[%s3484_s7 + $0x30] sm:$0xff] %v2031_v55  ;;  %v2032_v61 = vmax.f32 %v2024_v52, 0.0 }
 0x18c   : > { %2037 = vst [vmem:[%s3484_s7 + $0x20] sm:$0xff] %v2029_v59  ;;  %v2030_v62 = vmax.f32 %v2022_v60, 0.0 }
 0x18d   : > { %2040 = vst [vmem:[%s3484_s7 + $0x38] sm:$0xff] %v2032_v61 }
 0x18e   : > { %2038 = vst [vmem:[%s3484_s7 + $0x28] sm:$0xff] %v2030_v62 }
 0x18f PF: > { %s15_s20 = sadd.s32 1, %s2884_s20   ;;  %s3513_s18 = smov %s2880_s19 }
 0x190   : > { %p12_p5 = scmp.ge.s32.totalorder %s15_s20, 4   ;;  %s3514_s19 = smov %s3516_s21 }
 0x192   :  { %14 = sbr.rel (!%p12_p5) target bundleno = 2 (0x2), region = 82 }

</bundles_post_ra>
